<compile_context>
chip_gen: v6e
topology: v6e:2x2x1
jax: 0.10.0
libtpu: 0.0.40
codegen_flags: <defaults>
</compile_context>

<pallas_src>
import jax
import jax.numpy as jnp
from jax import lax
from jax.experimental import pallas as pl
from jax.experimental.pallas import tpu as pltpu


def attn_general_kernel(h_ref, enc_ref, w_ref, out_ref):
    # h_ref:   (B, H)     decoder hidden state rows
    # enc_ref: (L, B*H)   encoder outputs, minor dims flattened for a dense DMA
    # w_ref:   (H, H)     nn.Linear weight (out_features, in_features)
    # out_ref: (B, L)     softmax attention weights
    B, H = h_ref.shape
    L = enc_ref.shape[0]

    h = h_ref[...]                                                      # (B, H)
    # Fold the Linear onto the (small) hidden state:  h . (W e) == (h @ W) . e
    v = jnp.dot(h, w_ref[...], preferred_element_type=jnp.float32)     # (B, H)
    enc = enc_ref[...]                                                   # (L, B*H)

    # energies[b, l] = sum_j v[b, j] * enc[l, b*H + j]
    # Static unrolled loop over the tiny batch; each step is a (1,H)x(H,L)
    # MXU contraction that yields a lane-dense (1, L) row directly, so no
    # transpose / eye-matmul / 3-D intermediate is needed.
    # TODO(synk): for realistic B/L, replace the unrolled loop with a batched
    # dot_general and a grid over L (online softmax, "parallel" axis for v7x).
    rows = []
    for b in range(B):
        enc_b = enc[:, b * H:(b + 1) * H]                                # (L, H)
        rows.append(
            lax.dot_general(v[b:b + 1, :], enc_b,
                            (((1,), (1,)), ((), ())),
                            preferred_element_type=jnp.float32))        # (1, L)
    e_bl = jnp.concatenate(rows, axis=0)                                 # (B, L)

    # Row softmax over the sequence axis (torch F.softmax dim=1 on (B, L)).
    # The Linear bias adds the per-row constant h . bias to every logit and
    # cancels exactly under this softmax, so it is never computed.
    m = jnp.max(e_bl, axis=-1, keepdims=True)
    p = jnp.exp(e_bl - m)
    denom = jnp.sum(p, axis=-1, keepdims=True)
    out_ref[...] = p * pl.reciprocal(denom, approx=False)


def attn_forward(hidden, encoder_outputs, W, bias=None):
    """hidden: (1, B, H); encoder_outputs: (L, B, H); W: (H, H); bias: (H,).

    `bias` is accepted for interface parity with nn.Linear but intentionally
    unused: a per-row constant added to the logits is invariant under the row
    softmax, so it cannot affect the output.
    """
    L, B, H = encoder_outputs.shape
    assert hidden.shape == (1, B, H), "Attn expects num_layers == 1 hidden state"
    h = hidden.reshape(B, H)
    # Free, contiguous reshape: the dominant stream arrives as a dense
    # (sublane, lane) = (L, B*H) slab instead of padded (B, H) minor dims.
    enc2d = encoder_outputs.reshape(L, B * H)

    out = pl.pallas_call(
        attn_general_kernel,
        out_shape=jax.ShapeDtypeStruct((B, L), jnp.float32),
        in_specs=[
            pl.BlockSpec(memory_space=pltpu.MemorySpace.VMEM),   # hidden (B, H)
            pl.BlockSpec(memory_space=pltpu.MemorySpace.VMEM),   # encoder (L, B*H)
            pl.BlockSpec(memory_space=pltpu.MemorySpace.VMEM),   # W (H, H)
        ],
        out_specs=pl.BlockSpec(memory_space=pltpu.MemorySpace.VMEM),
    )(h, enc2d, W)

    return out[:, None, :]                                              # (B, 1, L)


def attn_forward_ref(hidden, encoder_outputs, W, bias):
    """Pure-JAX reference of the PyTorch forward (method='general'), bias included."""
    L, B, H = encoder_outputs.shape
    h = hidden.reshape(B, H)                                            # (B, H)
    e = jnp.einsum("lbh,kh->lbk", encoder_outputs, W) + bias            # Linear per position
    energies = jnp.einsum("lbk,bk->bl", e, h)                           # (B, L)
    return jax.nn.softmax(energies, axis=1)[:, None, :]                 # (B, 1, L)


if __name__ == "__main__":
    B, L, H = 2, 8, 32                                                  # small hidden_dim analog
    key = jax.random.PRNGKey(0)
    k1, k2, k3, k4 = jax.random.split(key, 4)

    hidden = jax.random.normal(k1, (1, B, H), dtype=jnp.float32)
    encoder_outputs = jax.random.normal(k2, (L, B, H), dtype=jnp.float32)
    # nn.Linear(H, H) parameters, deterministic init
    bound = 1.0 / (H ** 0.5)
    W = jax.random.uniform(k3, (H, H), minval=-bound, maxval=bound, dtype=jnp.float32)
    bias = jax.random.uniform(k4, (H,), minval=-bound, maxval=bound, dtype=jnp.float32)

    out = attn_forward(hidden, encoder_outputs, W, bias)
    out = jax.block_until_ready(out)

    ref = attn_forward_ref(hidden, encoder_outputs, W, bias)
    assert out.shape == (B, 1, L)
    assert jnp.allclose(out, ref, atol=1e-5, rtol=1e-5), "mismatch vs reference"

    print("KERNEL_OK")
</pallas_src>

<mosaic_0001>
module attributes {stable_mosaic.version = 11 : i64} {
  func.func @attn_general_kernel(%arg0: memref<2x32xf32, #tpu.memory_space<vmem>>, %arg1: memref<8x64xf32, #tpu.memory_space<vmem>>, %arg2: memref<32x32xf32, #tpu.memory_space<vmem>>, %arg3: memref<2x8xf32, #tpu.memory_space<vmem>>) attributes {dimension_semantics = [], scalar_prefetch = 0 : i64, scratch_operands = 0 : i64, tpu.core_type = #tpu.core_type<tc>} {
    %c0 = arith.constant 0 : index
    %c0_0 = arith.constant 0 : index
    %0 = vector.load %arg0[%c0, %c0_0] : memref<2x32xf32, #tpu.memory_space<vmem>>, vector<2x32xf32>
    %c0_1 = arith.constant 0 : index
    %c0_2 = arith.constant 0 : index
    %1 = vector.load %arg2[%c0_1, %c0_2] : memref<32x32xf32, #tpu.memory_space<vmem>>, vector<32x32xf32>
    %cst = arith.constant dense<0.000000e+00> : vector<2x32xf32>
    %2 = tpu.matmul %0, %1, %cst {dimension_numbers = #tpu.dot_dimension_numbers<[1], [0], [0], [1], [0, 0, 1, 1], [], []>} : vector<2x32xf32>, vector<32x32xf32>, vector<2x32xf32> -> vector<2x32xf32>
    %c0_3 = arith.constant 0 : index
    %c0_4 = arith.constant 0 : index
    %3 = vector.load %arg1[%c0_3, %c0_4] : memref<8x64xf32, #tpu.memory_space<vmem>>, vector<8x64xf32>
    %4 = vector.extract_strided_slice %3 {offsets = [0, 0], sizes = [8, 32], strides = [1, 1]} : vector<8x64xf32> to vector<8x32xf32>
    %5 = vector.extract_strided_slice %2 {offsets = [0, 0], sizes = [1, 32], strides = [1, 1]} : vector<2x32xf32> to vector<1x32xf32>
    %cst_5 = arith.constant dense<0.000000e+00> : vector<1x8xf32>
    %6 = tpu.matmul %5, %4, %cst_5 {dimension_numbers = #tpu.dot_dimension_numbers<[1], [1], [0], [0], [0, 0, 1, 0], [], []>} : vector<1x32xf32>, vector<8x32xf32>, vector<1x8xf32> -> vector<1x8xf32>
    %7 = vector.extract_strided_slice %3 {offsets = [0, 32], sizes = [8, 32], strides = [1, 1]} : vector<8x64xf32> to vector<8x32xf32>
    %8 = vector.extract_strided_slice %2 {offsets = [1, 0], sizes = [1, 32], strides = [1, 1]} : vector<2x32xf32> to vector<1x32xf32>
    %cst_6 = arith.constant dense<0.000000e+00> : vector<1x8xf32>
    %9 = tpu.matmul %8, %7, %cst_6 {dimension_numbers = #tpu.dot_dimension_numbers<[1], [1], [0], [0], [0, 0, 1, 0], [], []>} : vector<1x32xf32>, vector<8x32xf32>, vector<1x8xf32> -> vector<1x8xf32>
    %10 = tpu.concatenate %6, %9 in 0 : vector<1x8xf32>, vector<1x8xf32> -> vector<2x8xf32>
    %cst_7 = arith.constant dense<0xFF800000> : vector<2xf32>
    %11 = vector.multi_reduction <maximumf>, %10, %cst_7 [1] : vector<2x8xf32> to vector<2xf32>
    %12 = vector.shape_cast %11 : vector<2xf32> to vector<2x1xf32>
    %13 = vector.broadcast %12 : vector<2x1xf32> to vector<2x8xf32>
    %14 = arith.subf %10, %13 : vector<2x8xf32>
    %15 = math.exp %14 : vector<2x8xf32>
    %cst_8 = arith.constant dense<0.000000e+00> : vector<2xf32>
    %16 = vector.multi_reduction <add>, %15, %cst_8 [1] : vector<2x8xf32> to vector<2xf32>
    %17 = vector.shape_cast %16 : vector<2xf32> to vector<2x1xf32>
    %18 = tpu.reciprocal %17 : vector<2x1xf32> -> vector<2x1xf32>
    %19 = vector.broadcast %18 : vector<2x1xf32> to vector<2x8xf32>
    %20 = arith.mulf %15, %19 : vector<2x8xf32>
    %c0_9 = arith.constant 0 : index
    %c0_10 = arith.constant 0 : index
    %21 = vector.load %arg3[%c0_9, %c0_10] : memref<2x8xf32, #tpu.memory_space<vmem>>, vector<2x8xf32>
    tpu.vector_store %arg3[%c0_9, %c0_10], %20 {strides = array<i32>} : memref<2x8xf32, #tpu.memory_space<vmem>>, vector<2x8xf32>,
    return
  }
}

</mosaic_0001>

<bundles_post_ra>
// kernel: tpu_custom_call.1
= control target key start
LH: loop header
LB: loop body
LE: loop exit
PB: predicated region body
PF: predicated region fallthrough
CT: control target
= control target key end

     0   :  { %8 = vsyncpa [#allocation3], 0  ;;  %s505_s0 = inlined_call_operand.hbm [shape: f32[2,32], index: 0, kind: input, shape index: {}]   ;;  %s506_s1 = inlined_call_operand.hbm [shape: f32[8,64], index: 1, kind: input, shape index: {}]   ;;  %s507_s2 = inlined_call_operand.hbm [shape: f32[32,32], index: 2, kind: input, shape index: {}]   ;;  %s508_s3 = inlined_call_operand.hbm [shape: f32[2,8], index: 3, kind: output, shape index: {}]  }
   0x1   :  { %9 = vsyncpa [#allocation6], 0 }
   0x2   :  { %10 = vsyncpa [#allocation4], 0  ;;  %s453_s12 = smov [#allocation5]   ;;  %s454_s14 = smov [#allocation2]  }
   0x3   :  { %s27_s13 = sshll.u32 %s453_s12, 4  ;;  %s17_s15 = sshll.u32 %s454_s14, 4  ;;  %s28_s13 = int_to_ptr.vmem [resolvable:$true] %s27_s13  ;;  %s18_s15 = int_to_ptr.vmem [resolvable:$true] %s17_s15 }
   0x4   :  { %s375_s16 = scalar_lea.vmem %s28_s13, 128  ;;  %p380_p1 = scmp.lt.s32.totalorder %s28_s13, %s28_s13 }
   0x5   :  { %p376_p0 = scmp.ne.s32.totalorder %s28_s13, %s375_s16  ;;  %p381_p2 = scmp.lt.s32.totalorder %s375_s16, %s375_s16 }
   0x7   :  { %p382_p3 = por %p381_p2, %p380_p1 }
   0x9   :  { %p383_p4 = pnand %p382_p3, %p376_p0 }
   0xb   :  { %386 = shalt.err (!%p383_p4)
}
   0xc   :  { %30 = dma.hbm_to_vmem [thread:$0]  %s506_s1, 128, %s28_s13, [#allocation6]  }
   0xd   :  { %s395_s19 = scalar_lea.vmem %s18_s15, 32  ;;  %p400_p6 = scmp.lt.s32.totalorder %s18_s15, %s18_s15 }
   0xe   :  { %p396_p5 = scmp.ne.s32.totalorder %s18_s15, %s395_s19  ;;  %p401_p7 = scmp.lt.s32.totalorder %s395_s19, %s395_s19 }
  0x10   :  { %p402_p8 = por %p401_p7, %p400_p6 }
  0x12   :  { %p403_p9 = pnand %p402_p8, %p396_p5 }
  0x14   :  { %406 = shalt.err (!%p403_p9)
}
  0x15   :  { %20 = dma.hbm_to_vmem [thread:$0]  %s505_s0, 32, %s18_s15, [#allocation3]  }
  0x16   :  { %s455_s22 = smov [#allocation7]  }
  0x17   :  { %s36_s23 = sshll.u32 %s455_s22, 4  ;;  %s37_s23 = int_to_ptr.vmem [resolvable:$true] %s36_s23 }
  0x18   :  { %s415_s24 = scalar_lea.vmem %s37_s23, 512  ;;  %p420_p11 = scmp.lt.s32.totalorder %s37_s23, %s37_s23 }
  0x19   :  { %p416_p10 = scmp.ne.s32.totalorder %s37_s23, %s415_s24  ;;  %p421_p12 = scmp.lt.s32.totalorder %s415_s24, %s415_s24 }
  0x1b   :  { %p422_p13 = por %p421_p12, %p420_p11 }
  0x1d   :  { %p423_p0 = pnand %p422_p13, %p416_p10 }
  0x1f   :  { %426 = shalt.err (!%p423_p0)
}
  0x20   :  { %s456_s1 = smov 128   ;;  %s457_s25 = smov 8  }
  0x21   :  { %42 = dma.hbm_to_vmem [thread:$0]  %s507_s2, 512, %s37_s23, [#allocation6], %s456_s1, %s456_s1, %s457_s25  }
  0x22   :  { %447 = dma.done.wait [#allocation3], 32  }
  0x23   :  { %448 = vsyncadd [#allocation3], 4294967264 }
  0x24   :  { %449 = dma.done.wait [#allocation6], 640  }
  0x25   :  { %450 = vsyncadd [#allocation6], 4294966656  ;;  %v458_v0 = vmov 0.0   ;;  %vm459_vm0 = vmmov 0   ;;  %v56_v1 = vld [vmem:[#allocation7 + $0x18] sm:$0xff]  ;;  %v55_v2 = vld [vmem:[#allocation7 + $0x10] sm:$0xff] }
  0x26   :  { %333 = vmatprep.subr.mxu0 %v458_v0  ;;  %341 = vmatprep.mubr.msk.f32.mxu0 %vm459_vm0, %v458_v0  ;;  %v131_v3 = vld [vmem:[#allocation5] sm:$0xff]  ;;  %v54_v4 = vld [vmem:[#allocation7 + $0x8] sm:$0xff]  ;;  %vm57_vm1 = vcmask 261120   ;;  %s460_s0 = smov 96   ;;  %v53_v5 = vld [vmem:[#allocation7] sm:$0xff]  ;;  %vm288_vm2 = vcmask 1040384  }
  0x27   :  { %344 = vmatprep.subr.mxu1 %v458_v0  ;;  %346 = vmatprep.mubr.msk.f32.mxu1 %vm459_vm0, %v458_v0  ;;  %v52_v6 = vld [vmem:[#allocation2] sm:$0x3]  ;;  %vm290_vm3 = vcmask 58368   ;;  %s461_s2 = smov [#allocation8]  }
  0x28   :  { %334 = vmatpush3.msra.mxu0 %v56_v1  ;;  %209 = vrot.lane.b32.xlu0 %v131_v3, %s460_s0  ;;  %s309_s28 = sshll.u32 %s461_s2, 4  ;;  %s310_s28 = int_to_ptr.vmem [resolvable:$true] %s309_s28 }
  0x29   :  { %335 = vmatprep.subr.mxu0 %v458_v0  ;;  %345 = vmatpush3.xpose.msk.msra.mxu1 %vm57_vm1, %v131_v3  ;;  %s427_s29 = scalar_lea.vmem %s310_s28, 32  ;;  %p432_p2 = scmp.lt.s32.totalorder %s310_s28, %s310_s28 }
  0x2a   :  { %336 = vmatpush3.msra.mxu0 %v55_v2  ;;  %349 = vmatprep.subr.mxu1 %v458_v0  ;;  %p428_p1 = scmp.ne.s32.totalorder %s310_s28, %s427_s29  ;;  %p433_p3 = scmp.lt.s32.totalorder %s427_s29, %s427_s29 }
  0x2b   :  { %337 = vmatprep.subr.mxu0 %v458_v0 }
  0x2c   :  { %338 = vmatpush3.msra.mxu0 %v54_v4  ;;  %p434_p4 = por %p433_p3, %p432_p2 }
  0x2d   :  { %339 = vmatprep.subr.mxu0 %v458_v0 }
  0x2e   :  { %340 = vmatpush3.msra.mxu0 %v53_v5  ;;  %p435_p5 = pnand %p434_p4, %p428_p1 }
  0x2f   :  { %342 = vmatmul.mubr.msk.f32.vlgmr.msra.gmra.mxu0 %vm57_vm1, %v52_v6 }
  0x9a   :  { %v210_v7 = vpop.permute.xlu0 %209 }
  0xef   :  { %v127_v8 = vpop.f32.mrf.mxu0 }
  0xf0   :  { %347 = vmatmul.mubr.msk.f32.vlgmr.msra.gmra.mxu1 %vm57_vm1, %v127_v8  ;;  %v208_v10 = vrot.slane %v127_v8, 1 }
  0xf1   :  { %350 = vmatpush3.xpose.msk.msra.mxu1 %vm57_vm1, %v210_v7  ;;  %v343_v9 = vpop.f32.mrf.mxu0  ;;  %351 = vmatprep.mubr.msk.f32.mxu1 %vm459_vm0, %v458_v0 }
  0xf4   :  { %352 = vmatmul.mubr.msk.f32.vlgmr.msra.gmra.mxu1 %vm57_vm1, %v208_v10 }
 0x1b0   :  { %v204_v11 = vpop.f32.mrf.mxu1 }
 0x1b2   :  { %v348_v12 = vpop.f32.mrf.mxu1 }
 0x1b4   :  { %v281_v13 = vpop.f32.mrf.mxu1 }
 0x1b5   :  { %v286_v14 = vrot.slane %v281_v13, 7 }
 0x1b6   :  { %v353_v15 = vpop.f32.mrf.mxu1 }
 0x1b7   :  { %v289_v16 = vsel %vm288_vm2, %v204_v11, %v286_v14 }
 0x1b8   :  { %v291_v17 = vsel %vm290_vm3, %v289_v16, -inf }
 0x1b9   :  { %292 = vmax.xlane.f32.xlu0 %v291_v17 }
 0x242   :  { %v293_v18 = vpop.xlane.xlu0 %292 }
 0x243   :  { %v294_v19 = vsub.f32 %v289_v16, %v293_v18 }
 0x245   :  { %v295_v20 = vmul.f32 1.442695, %v294_v19 }
 0x247   :  { %363 = vpow2.f32 %v295_v20 }
 0x254   :  { %v364_v21 = vpop.eup %363 }
 0x255   :  { %v297_v22 = vsel %vm290_vm3, %v364_v21, 0.0 }
 0x256   :  { %298 = vadd.xlane.f32.xlu1 %v297_v22 }
 0x2df   :  { %v299_v23 = vpop.xlane.xlu1 %298 }
 0x2e0   :  { %365 = vrcp.f32 %v299_v23 }
 0x2ed   :  { %v366_v24 = vpop.eup %365 }
 0x2ee   :  { %v301_v25 = vmul.f32 %v366_v24, %v364_v21 }
 0x2f0   :  { %302 = vst.msk [vmem:[#allocation8] sm:$0x3] %vm290_vm3, %v301_v25 }
 0x2f1   :  { %438 = shalt.err (!%p435_p5)
}
 0x2f2   :  { %312 = dma.vmem_to_hbm [thread:$0]  %s310_s28, 32, %s508_s3, [#allocation4]  }
 0x2f3   :  { %451 = dma.done.wait [#allocation4], 32  }
 0x2f4   :  { %452 = vsyncadd [#allocation4], 4294967264 }
 0x2f5   :  { %316 = vsyncpa [#allocation3], 1 }
 0x2f6   :  { %317 = vsyncpa [#allocation6], 1 }
 0x2f7   :  { %318 = vsyncpa [#allocation4], 1 }

</bundles_post_ra>
